<compile_context>
chip_gen: v5e
topology: v5e:2x2
jax: 0.10.0
libtpu: 0.0.40
codegen_flags: <defaults>
</compile_context>

<pallas_src>
import math
import functools

import jax
import jax.numpy as jnp
from jax.experimental import pallas as pl
from jax.experimental.pallas import tpu as pltpu


# ----------------------------------------------------------------------------
# Parameter / buffer construction (mirrors PositionalEncoding.__init__)
# ----------------------------------------------------------------------------
def make_positional_encoding_buffer(d_model: int, max_len: int = 5000,
                                    dtype=jnp.float32):
    position = jnp.arange(max_len, dtype=jnp.float32)[:, None]          # (max_len, 1)
    div_term = jnp.exp(jnp.arange(0, d_model, 2, dtype=jnp.float32)
                       * (-math.log(10000.0) / d_model))                # (d_model/2,)
    pe = jnp.zeros((max_len, 1, d_model), dtype=jnp.float32)
    pe = pe.at[:, 0, 0::2].set(jnp.sin(position * div_term))
    pe = pe.at[:, 0, 1::2].set(jnp.cos(position * div_term))
    return pe.astype(dtype)


# ----------------------------------------------------------------------------
# Pallas kernels
# ----------------------------------------------------------------------------
def _pe_add_kernel(x_ref, pe_ref, o_ref):
    # x_ref: (ts, B, D), pe_ref: (ts, 1, D) -> broadcast add over batch.
    o_ref[...] = x_ref[...] + pe_ref[...]


def _uhash32(x):
    # "lowbias32" integer mixer: a few VPU int ops per element; this kernel is
    # HBM-bound, so the hash is effectively free.
    x = x ^ (x >> 16)
    x = x * jnp.uint32(0x7FEB352D)
    x = x ^ (x >> 15)
    x = x * jnp.uint32(0x846CA68B)
    x = x ^ (x >> 16)
    return x


def _pe_add_dropout_kernel(seed_ref, x_ref, pe_ref, o_ref, *, threshold, scale):
    # Training-mode dropout: keep with prob (1 - rate), scale survivors by
    # 1/(1 - rate).  Random bits come from a stateless counter hash of the
    # global element index + seed: deterministic, block-order independent, and
    # lowers on both Mosaic and interpret mode.
    # TODO(synk): RNG stream differs from torch.nn.Dropout (counter-hash PRNG,
    # 32-bit threshold resolution).
    ts, B, D = x_ref.shape
    y = x_ref[...] + pe_ref[...]

    r = (jax.lax.broadcasted_iota(jnp.int32, (ts, B, D), 0)
         + pl.program_id(0) * ts)                       # global seq position
    b = jax.lax.broadcasted_iota(jnp.int32, (ts, B, D), 1)
    d = jax.lax.broadcasted_iota(jnp.int32, (ts, B, D), 2)
    idx = ((r * B + b) * D + d).astype(jnp.uint32)      # global element index

    seed = seed_ref[0].astype(jnp.uint32) * jnp.uint32(0x9E3779B9)
    bits = _uhash32(idx ^ seed)

    keep = bits >= jnp.uint32(threshold)                # P(keep) = 1 - rate
    o_ref[...] = jnp.where(keep, y * scale, 0.0).astype(o_ref.dtype)


# ----------------------------------------------------------------------------
# Wrapper (forward pass)
# ----------------------------------------------------------------------------
def positional_encoding_forward(x, pe, *, dropout_rate: float = 0.1,
                                training: bool = False, seed: int = 0,
                                vmem_block_budget_bytes: int = 12 * 1024 * 1024):
    """x: (S, B, D); pe: (max_len, 1, D) with S <= max_len.

    Returns dropout(x + pe[:S]) (dropout is identity when training=False).
    """
    S, B, D = x.shape
    max_len = pe.shape[0]
    assert pe.shape == (max_len, 1, D) and S <= max_len
    if pe.dtype != x.dtype:
        # Build the buffer in x.dtype up front to avoid this per-call cast.
        pe = pe.astype(x.dtype)

    # --- Tile sizing from bytes: double-buffered (x + out + pe) blocks. ------
    itemsize = jnp.dtype(x.dtype).itemsize
    per_row_bytes = (2 * B * D + D) * itemsize          # x row + out row + pe row
    ts = max(1, vmem_block_budget_bytes // (2 * per_row_bytes))
    if ts >= 8:
        ts = (ts // 8) * 8
    ts = min(ts, S)

    grid = (pl.cdiv(S, ts),)
    x_spec = pl.BlockSpec((ts, B, D), lambda i: (i, 0, 0))
    pe_spec = pl.BlockSpec((ts, 1, D), lambda i: (i, 0, 0))   # windows full pe buffer
    o_spec = pl.BlockSpec((ts, B, D), lambda i: (i, 0, 0))
    out_shape = jax.ShapeDtypeStruct((S, B, D), x.dtype)

    cparams = pltpu.CompilerParams(
        dimension_semantics=("parallel",),                # megacore on v7x
        vmem_limit_bytes=32 * 1024 * 1024,                # safe on v5e/v6e/v7x
    )

    if (not training) or dropout_rate <= 0.0:
        return pl.pallas_call(
            _pe_add_kernel,
            grid=grid,
            in_specs=[x_spec, pe_spec],
            out_specs=o_spec,
            out_shape=out_shape,
            compiler_params=cparams,
        )(x, pe)

    if dropout_rate >= 1.0:
        # torch.nn.Dropout(p=1.0) zeroes everything; avoid 1/(1-p) divide.
        return jnp.zeros((S, B, D), x.dtype)

    threshold = min(int(round(dropout_rate * (2 ** 32))), 2 ** 32 - 1)
    scale = 1.0 / (1.0 - dropout_rate)
    kernel = functools.partial(_pe_add_dropout_kernel,
                               threshold=threshold, scale=scale)
    seed_arr = jnp.asarray([seed], dtype=jnp.int32)

    return pl.pallas_call(
        kernel,
        grid=grid,
        in_specs=[pl.BlockSpec(memory_space=pltpu.MemorySpace.SMEM),
                  x_spec, pe_spec],
        out_specs=o_spec,
        out_shape=out_shape,
        compiler_params=cparams,
    )(seed_arr, x, pe)


# ----------------------------------------------------------------------------
# Demo / self-test
# ----------------------------------------------------------------------------
if __name__ == "__main__":
    d_model = 32
    seq_len = 8
    batch = 2

    key = jax.random.PRNGKey(0)
    x = jax.random.normal(key, (seq_len, batch, d_model), dtype=jnp.float32)
    pe = make_positional_encoding_buffer(d_model, max_len=5000, dtype=x.dtype)

    # Eval-mode forward (deterministic): dropout is identity.
    out = positional_encoding_forward(x, pe, dropout_rate=0.1, training=False)
    out = jax.block_until_ready(out)

    ref = x + pe[:seq_len]
    assert out.shape == (seq_len, batch, d_model)
    assert jnp.allclose(out, ref, atol=1e-6), "eval-mode mismatch vs reference"

    # Training-mode (dropout) kernel: surviving elements must equal ref/(1-p).
    rate = 0.1
    out_train = positional_encoding_forward(
        x, pe, dropout_rate=rate, training=True, seed=123)
    out_train = jax.block_until_ready(out_train)
    kept = out_train != 0.0
    assert jnp.allclose(jnp.where(kept, out_train, 0.0),
                        jnp.where(kept, ref / (1.0 - rate), 0.0),
                        atol=1e-5), "training-mode mismatch vs reference"

    print("KERNEL_OK")
</pallas_src>

<mosaic_0001>
module attributes {stable_mosaic.version = 11 : i64} {
  func.func @_pe_add_kernel(%arg0: i32, %arg1: memref<8x2x32xf32, #tpu.memory_space<vmem>>, %arg2: memref<8x1x32xf32, #tpu.memory_space<vmem>>, %arg3: memref<8x2x32xf32, #tpu.memory_space<vmem>>) attributes {dimension_semantics = [#tpu.dimension_semantics<parallel>], iteration_bounds = array<i64: 1>, scalar_prefetch = 0 : i64, scratch_operands = 0 : i64, tpu.core_type = #tpu.core_type<tc>, window_params = [{transform_indices = @transform_0, window_bounds = array<i64: 8, 2, 32>}, {transform_indices = @transform_1, window_bounds = array<i64: 8, 1, 32>}, {transform_indices = @transform_2, window_bounds = array<i64: 8, 2, 32>}]} {
    %c0 = arith.constant 0 : index
    %c0_0 = arith.constant 0 : index
    %c0_1 = arith.constant 0 : index
    %0 = vector.load %arg1[%c0, %c0_0, %c0_1] : memref<8x2x32xf32, #tpu.memory_space<vmem>>, vector<8x2x32xf32>
    %c0_2 = arith.constant 0 : index
    %c0_3 = arith.constant 0 : index
    %c0_4 = arith.constant 0 : index
    %1 = vector.load %arg2[%c0_2, %c0_3, %c0_4] : memref<8x1x32xf32, #tpu.memory_space<vmem>>, vector<8x1x32xf32>
    %2 = vector.broadcast %1 : vector<8x1x32xf32> to vector<8x2x32xf32>
    %3 = arith.addf %0, %2 : vector<8x2x32xf32>
    %c0_5 = arith.constant 0 : index
    %c0_6 = arith.constant 0 : index
    %c0_7 = arith.constant 0 : index
    %4 = vector.load %arg3[%c0_5, %c0_6, %c0_7] : memref<8x2x32xf32, #tpu.memory_space<vmem>>, vector<8x2x32xf32>
    tpu.vector_store %arg3[%c0_5, %c0_6, %c0_7], %3 {strides = array<i32>} : memref<8x2x32xf32, #tpu.memory_space<vmem>>, vector<8x2x32xf32>,
    return
  }
  func.func @transform_0(%arg0: i32) -> (i32, i32, i32) {
    %c0_i32 = arith.constant 0 : i32
    %c0_i32_0 = arith.constant 0 : i32
    %c0_i32_1 = arith.constant 0 : i32
    return %arg0, %c0_i32, %c0_i32_0 : i32, i32, i32
  }
  func.func @transform_1(%arg0: i32) -> (i32, i32, i32) {
    %c0_i32 = arith.constant 0 : i32
    %c0_i32_0 = arith.constant 0 : i32
    %c0_i32_1 = arith.constant 0 : i32
    return %arg0, %c0_i32, %c0_i32_0 : i32, i32, i32
  }
  func.func @transform_2(%arg0: i32) -> (i32, i32, i32) {
    %c0_i32 = arith.constant 0 : i32
    %c0_i32_0 = arith.constant 0 : i32
    %c0_i32_1 = arith.constant 0 : i32
    return %arg0, %c0_i32, %c0_i32_0 : i32, i32, i32
  }
}

</mosaic_0001>

<bundles_post_ra>
// kernel: tpu_custom_call.1
= control target key start
LH: loop header
LB: loop body
LE: loop exit
PB: predicated region body
PF: predicated region fallthrough
CT: control target
= control target key end

     0   :  { %vm60_vm0 = vcmask 254976   ;;  %s201_s0 = inlined_call_operand.vmem [shape: f32[8,2,32], index: 0, kind: input, shape index: {}]   ;;  %s202_s1 = inlined_call_operand.vmem [shape: f32[5000,1,32], index: 1, kind: input, shape index: {}]   ;;  %s203_s2 = inlined_call_operand.hbm [shape: f32[8,2,32], index: 2, kind: output, shape index: {}]  }
   0x1   :  { %v12_v0 = vld [vmem:[%s201_s0] sm:$0x3]  ;;  %v13_v2 = vld [vmem:[%s201_s0 + $0x2] sm:$0x3]  ;;  %v14_v5 = vld [vmem:[%s201_s0 + $0x4] sm:$0x3] }
   0x2   :  { %v90_v1 = vld [vmem:[%s202_s1] ss:$0 sm:$0xff]  ;;  %v91_v4 = vld [vmem:[%s202_s1 + $0x1] ss:$0 sm:$0xff]  ;;  %v92_v6 = vld [vmem:[%s202_s1 + $0x2] ss:$0 sm:$0xff] }
   0x3   :  { %v52_v3 = vadd.f32 %v90_v1, %v12_v0  ;;  %v15_v7 = vld [vmem:[%s201_s0 + $0x6] sm:$0x3]  ;;  %v53_v8 = vadd.f32 %v91_v4, %v13_v2  ;;  %v93_v9 = vld [vmem:[%s202_s1 + $0x3] ss:$0 sm:$0xff]  ;;  %v16_v10 = vld [vmem:[%s201_s0 + $0x8] sm:$0x3]  ;;  %v54_v11 = vadd.f32 %v92_v6, %v14_v5 }
   0x4   :  { %v94_v12 = vld [vmem:[%s202_s1 + $0x4] ss:$0 sm:$0xff]  ;;  %v17_v13 = vld [vmem:[%s201_s0 + $0xa] sm:$0x3]  ;;  %v55_v14 = vadd.f32 %v93_v9, %v15_v7  ;;  %v95_v15 = vld [vmem:[%s202_s1 + $0x5] ss:$0 sm:$0xff] }
   0x5   :  { %61 = vst.msk [vmem:[#allocation2] sm:$0x3] %vm60_vm0, %v52_v3  ;;  %v56_v16 = vadd.f32 %v94_v12, %v16_v10  ;;  %v18_v17 = vld [vmem:[%s201_s0 + $0xc] sm:$0x3]  ;;  %v57_v18 = vadd.f32 %v95_v15, %v17_v13  ;;  %v96_v19 = vld [vmem:[%s202_s1 + $0x6] ss:$0 sm:$0xff] }
   0x6   :  { %62 = vst.msk [vmem:[#allocation2 + $0x2] sm:$0x3] %vm60_vm0, %v53_v8  ;;  %v19_v20 = vld [vmem:[%s201_s0 + $0xe] sm:$0x3]  ;;  %v97_v21 = vld [vmem:[%s202_s1 + $0x7] ss:$0 sm:$0xff]  ;;  %v58_v22 = vadd.f32 %v96_v19, %v18_v17 }
   0x7   :  { %63 = vst.msk [vmem:[#allocation2 + $0x4] sm:$0x3] %vm60_vm0, %v54_v11 }
   0x8   :  { %64 = vst.msk [vmem:[#allocation2 + $0x6] sm:$0x3] %vm60_vm0, %v55_v14 }
   0x9   :  { %65 = vst.msk [vmem:[#allocation2 + $0x8] sm:$0x3] %vm60_vm0, %v56_v16 }
   0xa   :  { %66 = vst.msk [vmem:[#allocation2 + $0xa] sm:$0x3] %vm60_vm0, %v57_v18 }
   0xb   :  { %7 = vsyncpa [#allocation3], 0  ;;  %s124_s13 = smov [#allocation2]   ;;  %s75_s17 = sshll.u32 %s203_s2, 4  ;;  %v59_v23 = vadd.f32 %v97_v21, %v19_v20  ;;  %67 = vst.msk [vmem:[#allocation2 + $0xc] sm:$0x3] %vm60_vm0, %v58_v22  ;;  %s76_s17 = int_to_ptr.hbm [resolvable:$true] %s75_s17 }
   0xc   :  { %s73_s14 = sshll.u32 %s124_s13, 4  ;;  %s125_s0 = smov 32   ;;  %s74_s14 = int_to_ptr.vmem [resolvable:$true] %s73_s14 }
   0xd   :  { %68 = vst.msk [vmem:[#allocation2 + $0xe] sm:$0x3] %vm60_vm0, %v59_v23  ;;  %s126_s18 = smov 2  }
   0xe   :  { %81 = dma.vmem_to_hbm [thread:$0]  %s74_s14, 256, %s76_s17, [#allocation3], %s125_s0, %s125_s0, %s126_s18  }
   0xf   :  { %122 = dma.done.wait [#allocation3], 256  }
  0x10   :  { %123 = vsyncadd [#allocation3], 4294967040 }
  0x11   :  { %86 = vsyncpa [#allocation3], 1 }

</bundles_post_ra>
